<compile_context>
chip_gen: v7x
topology: tpu7x:2x2x1
jax: 0.10.0
libtpu: 0.0.40
codegen_flags: <defaults>
</compile_context>

<pallas_src>
import functools

import jax
import jax.numpy as jnp
import numpy as np
from jax import lax
from jax.experimental import pallas as pl
from jax.experimental.pallas import tpu as pltpu


def _attention_kernel(xq_ref, xkv_ref, wq_ref, wkv_ref, wproj_ref, bproj_ref,
                      o_ref, *, num_heads, head_dim):
    # xq_ref:    (1, TQ, C)  bf16  query rows of the current tile
    # xkv_ref:   (1, N,  C)  bf16  full sequence (for K/V)
    # wq_ref:    (C, C)      bf16  Q weight^T with softmax scale folded in
    # wkv_ref:   (C, 2C)     bf16  [K | V] weight^T
    # wproj_ref: (C, C)      bf16  proj weight^T
    # bproj_ref: (1, C)      f32   proj bias
    # o_ref:     (1, TQ, C)  f32
    C = num_heads * head_dim

    xq = xq_ref[0]                      # (TQ, C) bf16
    xkv = xkv_ref[0]                    # (N,  C) bf16

    # Projections: bf16 operands, f32 accumulation on the MXU.
    # TODO(synk): when N is tiled into multiple query tiles, the K/V projection
    # is recomputed per tile; for large N cache it in VMEM scratch at qi==0.
    q = jnp.dot(xq, wq_ref[...], preferred_element_type=jnp.float32)      # (TQ, C)
    kv = jnp.dot(xkv, wkv_ref[...], preferred_element_type=jnp.float32)   # (N, 2C)

    q = q.astype(jnp.bfloat16)
    k = kv[:, :C].astype(jnp.bfloat16)
    v = kv[:, C:].astype(jnp.bfloat16)

    wproj = wproj_ref[...]              # (C, C) bf16

    # Accumulator pre-seeded with the proj bias (folds the final add away).
    out_acc = jnp.broadcast_to(bproj_ref[...],
                               o_ref.shape[1:]).astype(jnp.float32)       # (TQ, C)

    for h in range(num_heads):          # static trip count, traced once
        lo, hi = h * head_dim, (h + 1) * head_dim
        qh = q[:, lo:hi]                # (TQ, hd) bf16 (scale already folded into Wq)
        kh = k[:, lo:hi]                # (N,  hd) bf16
        vh = v[:, lo:hi]                # (N,  hd) bf16

        # s = q @ k^T via dot_general (no explicit transpose materialized).
        s = lax.dot_general(qh, kh, (((1,), (1,)), ((), ())),
                            preferred_element_type=jnp.float32)           # (TQ, N) f32

        # Softmax in f32; normalization deferred to after the PV matmul.
        s_max = jnp.max(s, axis=-1, keepdims=True)
        p = jnp.exp(s - s_max)
        denom = jnp.sum(p, axis=-1, keepdims=True)
        oh = jnp.dot(p.astype(jnp.bfloat16), vh,
                     preferred_element_type=jnp.float32)                  # (TQ, hd)
        oh = oh * pl.reciprocal(denom, approx=True)

        # Fold head concat into the output projection (lane-dense accumulation):
        # out += oh @ Wproj^T[h*hd:(h+1)*hd, :]
        out_acc = out_acc + jnp.dot(oh.astype(jnp.bfloat16), wproj[lo:hi, :],
                                    preferred_element_type=jnp.float32)

    o_ref[0] = out_acc.astype(o_ref.dtype)


def prepare_attention_params(w_qkv, w_proj, b_proj, num_heads):
    """One-time weight preprocessing (transpose, scale-fold, bf16 cast).

    w_qkv: (3C, C) torch nn.Linear weight (rows = [Q | K | V] outputs)
    w_proj: (C, C) torch nn.Linear weight;  b_proj: (C,)
    """
    three_c, C = w_qkv.shape
    assert three_c == 3 * C and C % num_heads == 0
    head_dim = C // num_heads
    scale = float(head_dim) ** -0.5

    w_qkv = jnp.asarray(w_qkv, jnp.float32)
    wq_t = (w_qkv[:C, :].T * scale).astype(jnp.bfloat16)        # (C, C), scale folded
    wkv_t = w_qkv[C:, :].T.astype(jnp.bfloat16)                 # (C, 2C) = [K | V]
    wproj_t = jnp.asarray(w_proj, jnp.float32).T.astype(jnp.bfloat16)   # (C, C)
    b2d = jnp.asarray(b_proj, jnp.float32).reshape(1, C)
    return wq_t, wkv_t, wproj_t, b2d


def attention_pallas(x, params, num_heads):
    """x: (B, N, C) float; params from prepare_attention_params."""
    wq_t, wkv_t, wproj_t, b2d = params
    B, N, C = x.shape
    assert C % num_heads == 0
    head_dim = C // num_heads

    # Query-row tiling: 128-row tiles when possible, otherwise full sequence.
    # TODO(synk): pad N for arbitrary sequence lengths (e.g. N=197) to keep 128-tiles.
    tile_q = 128 if N % 128 == 0 else N

    x_bf = x.astype(jnp.bfloat16)

    kernel = functools.partial(_attention_kernel,
                               num_heads=num_heads, head_dim=head_dim)

    # Weights/bias never change across the grid -> single buffer (no dead VMEM copy).
    const_buf = pl.Buffered(1)

    return pl.pallas_call(
        kernel,
        out_shape=jax.ShapeDtypeStruct((B, N, C), jnp.float32),
        grid_spec=pltpu.PrefetchScalarGridSpec(
            num_scalar_prefetch=0,
            grid=(B, N // tile_q),
            in_specs=[
                pl.BlockSpec((1, tile_q, C), lambda b, qi: (b, qi, 0)),   # x (Q rows)
                pl.BlockSpec((1, N, C), lambda b, qi: (b, 0, 0)),         # x (K/V rows)
                pl.BlockSpec((C, C), lambda b, qi: (0, 0),
                             pipeline_mode=const_buf),                    # Wq^T * scale
                pl.BlockSpec((C, 2 * C), lambda b, qi: (0, 0),
                             pipeline_mode=const_buf),                    # [Wk|Wv]^T
                pl.BlockSpec((C, C), lambda b, qi: (0, 0),
                             pipeline_mode=const_buf),                    # Wproj^T
                pl.BlockSpec((1, C), lambda b, qi: (0, 0),
                             pipeline_mode=const_buf),                    # bias
            ],
            out_specs=pl.BlockSpec((1, tile_q, C), lambda b, qi: (b, qi, 0)),
        ),
        compiler_params=pltpu.CompilerParams(
            dimension_semantics=("parallel", "parallel"),
            vmem_limit_bytes=32 * 1024 * 1024,
        ),
    )(x_bf, x_bf, wq_t, wkv_t, wproj_t, b2d)


def attention_ref(x, w_qkv, w_proj, b_proj, num_heads):
    """Pure-JAX f32 reference mirroring the PyTorch forward."""
    B, N, C = x.shape
    head_dim = C // num_heads
    scale = head_dim ** (-0.5)
    qkv = x @ w_qkv.T                                    # (B, N, 3C)
    qkv = qkv.reshape(B, N, 3, num_heads, head_dim).transpose(2, 0, 3, 1, 4)
    q, k, v = qkv[0], qkv[1], qkv[2]                     # (B, H, N, hd)
    attn = (q @ jnp.swapaxes(k, -1, -2)) * scale         # (B, H, N, N)
    attn = jax.nn.softmax(attn, axis=-1)
    out = attn @ v                                       # (B, H, N, hd)
    out = jnp.swapaxes(out, 1, 2).reshape(B, N, C)
    return out @ w_proj.T + b_proj


if __name__ == "__main__":
    B, N, C = 2, 8, 32
    NUM_HEADS = 4

    key = jax.random.PRNGKey(0)
    kx, kqkv, kproj, kbias = jax.random.split(key, 4)

    x = jax.random.normal(kx, (B, N, C), dtype=jnp.float32)
    # nn.Linear(dim, 3*dim, bias=False): weight (3C, C)
    w_qkv = jax.random.normal(kqkv, (3 * C, C), dtype=jnp.float32) * (1.0 / np.sqrt(C))
    # nn.Linear(dim, dim): weight (C, C), bias (C,)
    w_proj = jax.random.normal(kproj, (C, C), dtype=jnp.float32) * (1.0 / np.sqrt(C))
    b_proj = jax.random.normal(kbias, (C,), dtype=jnp.float32) * 0.01

    params = prepare_attention_params(w_qkv, w_proj, b_proj, NUM_HEADS)  # one-time prep
    out = attention_pallas(x, params, NUM_HEADS)
    out = jax.block_until_ready(out)

    ref = attention_ref(x, w_qkv, w_proj, b_proj, NUM_HEADS)
    # Loose tolerance: kernel runs bf16 matmuls (f32 accum) + approx reciprocal,
    # reference is pure f32.
    np.testing.assert_allclose(np.asarray(out), np.asarray(ref), rtol=5e-2, atol=8e-2)
    print("KERNEL_OK")
</pallas_src>

<mosaic_0001>
module attributes {stable_mosaic.version = 11 : i64} {
  func.func @_attention_kernel(%arg0: i32, %arg1: i32, %arg2: memref<1x8x32xbf16, #tpu.memory_space<vmem>>, %arg3: memref<1x8x32xbf16, #tpu.memory_space<vmem>>, %arg4: memref<32x32xbf16, #tpu.memory_space<vmem>>, %arg5: memref<32x64xbf16, #tpu.memory_space<vmem>>, %arg6: memref<32x32xbf16, #tpu.memory_space<vmem>>, %arg7: memref<1x32xf32, #tpu.memory_space<vmem>>, %arg8: memref<1x8x32xf32, #tpu.memory_space<vmem>>) attributes {dimension_semantics = [#tpu.dimension_semantics<parallel>, #tpu.dimension_semantics<parallel>], iteration_bounds = array<i64: 2, 1>, scalar_prefetch = 0 : i64, scratch_operands = 0 : i64, tpu.core_type = #tpu.core_type<tc>, window_params = [{transform_indices = @transform_0, window_bounds = array<i64: 1, 8, 32>}, {transform_indices = @transform_1, window_bounds = array<i64: 1, 8, 32>}, {pipeline_mode = #tpu.pipeline_mode<synchronous>, transform_indices = @transform_2, window_bounds = array<i64: 32, 32>}, {pipeline_mode = #tpu.pipeline_mode<synchronous>, transform_indices = @transform_3, window_bounds = array<i64: 32, 64>}, {pipeline_mode = #tpu.pipeline_mode<synchronous>, transform_indices = @transform_4, window_bounds = array<i64: 32, 32>}, {pipeline_mode = #tpu.pipeline_mode<synchronous>, transform_indices = @transform_5, window_bounds = array<i64: 1, 32>}, {transform_indices = @transform_6, window_bounds = array<i64: 1, 8, 32>}]} {
    %c0 = arith.constant 0 : index
    %c0_0 = arith.constant 0 : index
    %c0_1 = arith.constant 0 : index
    %0 = vector.load %arg2[%c0, %c0_0, %c0_1] : memref<1x8x32xbf16, #tpu.memory_space<vmem>>, vector<1x8x32xbf16>
    %1 = vector.shape_cast %0 : vector<1x8x32xbf16> to vector<8x32xbf16>
    %c0_2 = arith.constant 0 : index
    %c0_3 = arith.constant 0 : index
    %c0_4 = arith.constant 0 : index
    %2 = vector.load %arg3[%c0_2, %c0_3, %c0_4] : memref<1x8x32xbf16, #tpu.memory_space<vmem>>, vector<1x8x32xbf16>
    %3 = vector.shape_cast %2 : vector<1x8x32xbf16> to vector<8x32xbf16>
    %c0_5 = arith.constant 0 : index
    %c0_6 = arith.constant 0 : index
    %4 = vector.load %arg4[%c0_5, %c0_6] : memref<32x32xbf16, #tpu.memory_space<vmem>>, vector<32x32xbf16>
    %cst = arith.constant dense<0.000000e+00> : vector<8x32xf32>
    %5 = tpu.matmul %1, %4, %cst {dimension_numbers = #tpu.dot_dimension_numbers<[1], [0], [0], [1], [0, 0, 1, 1], [], []>} : vector<8x32xbf16>, vector<32x32xbf16>, vector<8x32xf32> -> vector<8x32xf32>
    %c0_7 = arith.constant 0 : index
    %c0_8 = arith.constant 0 : index
    %6 = vector.load %arg5[%c0_7, %c0_8] : memref<32x64xbf16, #tpu.memory_space<vmem>>, vector<32x64xbf16>
    %cst_9 = arith.constant dense<0.000000e+00> : vector<8x64xf32>
    %7 = tpu.matmul %3, %6, %cst_9 {dimension_numbers = #tpu.dot_dimension_numbers<[1], [0], [0], [1], [0, 0, 1, 1], [], []>} : vector<8x32xbf16>, vector<32x64xbf16>, vector<8x64xf32> -> vector<8x64xf32>
    %8 = arith.truncf %5 : vector<8x32xf32> to vector<8x32xbf16>
    %9 = vector.extract_strided_slice %7 {offsets = [0, 0], sizes = [8, 32], strides = [1, 1]} : vector<8x64xf32> to vector<8x32xf32>
    %10 = arith.truncf %9 : vector<8x32xf32> to vector<8x32xbf16>
    %11 = vector.extract_strided_slice %7 {offsets = [0, 32], sizes = [8, 32], strides = [1, 1]} : vector<8x64xf32> to vector<8x32xf32>
    %12 = arith.truncf %11 : vector<8x32xf32> to vector<8x32xbf16>
    %c0_10 = arith.constant 0 : index
    %c0_11 = arith.constant 0 : index
    %13 = vector.load %arg6[%c0_10, %c0_11] : memref<32x32xbf16, #tpu.memory_space<vmem>>, vector<32x32xbf16>
    %c0_12 = arith.constant 0 : index
    %c0_13 = arith.constant 0 : index
    %14 = vector.load %arg7[%c0_12, %c0_13] : memref<1x32xf32, #tpu.memory_space<vmem>>, vector<1x32xf32>
    %15 = vector.shape_cast %14 : vector<1x32xf32> to vector<1x32xf32>
    %16 = vector.broadcast %15 : vector<1x32xf32> to vector<8x32xf32>
    %17 = vector.extract_strided_slice %8 {offsets = [0, 0], sizes = [8, 8], strides = [1, 1]} : vector<8x32xbf16> to vector<8x8xbf16>
    %18 = vector.extract_strided_slice %10 {offsets = [0, 0], sizes = [8, 8], strides = [1, 1]} : vector<8x32xbf16> to vector<8x8xbf16>
    %19 = vector.extract_strided_slice %12 {offsets = [0, 0], sizes = [8, 8], strides = [1, 1]} : vector<8x32xbf16> to vector<8x8xbf16>
    %cst_14 = arith.constant dense<0.000000e+00> : vector<8x8xf32>
    %20 = tpu.matmul %17, %18, %cst_14 {dimension_numbers = #tpu.dot_dimension_numbers<[1], [1], [0], [0], [0, 0, 1, 0], [], []>} : vector<8x8xbf16>, vector<8x8xbf16>, vector<8x8xf32> -> vector<8x8xf32>
    %cst_15 = arith.constant dense<0xFF800000> : vector<8xf32>
    %21 = vector.multi_reduction <maximumf>, %20, %cst_15 [1] : vector<8x8xf32> to vector<8xf32>
    %22 = vector.shape_cast %21 : vector<8xf32> to vector<8x1xf32>
    %23 = vector.broadcast %22 : vector<8x1xf32> to vector<8x8xf32>
    %24 = arith.subf %20, %23 : vector<8x8xf32>
    %25 = math.exp %24 : vector<8x8xf32>
    %cst_16 = arith.constant dense<0.000000e+00> : vector<8xf32>
    %26 = vector.multi_reduction <add>, %25, %cst_16 [1] : vector<8x8xf32> to vector<8xf32>
    %27 = vector.shape_cast %26 : vector<8xf32> to vector<8x1xf32>
    %28 = arith.truncf %25 : vector<8x8xf32> to vector<8x8xbf16>
    %cst_17 = arith.constant dense<0.000000e+00> : vector<8x8xf32>
    %29 = tpu.matmul %28, %19, %cst_17 {dimension_numbers = #tpu.dot_dimension_numbers<[1], [0], [0], [1], [0, 0, 1, 1], [], []>} : vector<8x8xbf16>, vector<8x8xbf16>, vector<8x8xf32> -> vector<8x8xf32>
    %30 = tpu.reciprocal %27 {approx = true} : vector<8x1xf32> -> vector<8x1xf32>
    %31 = vector.broadcast %30 : vector<8x1xf32> to vector<8x8xf32>
    %32 = arith.mulf %29, %31 : vector<8x8xf32>
    %33 = arith.truncf %32 : vector<8x8xf32> to vector<8x8xbf16>
    %34 = vector.extract_strided_slice %13 {offsets = [0, 0], sizes = [8, 32], strides = [1, 1]} : vector<32x32xbf16> to vector<8x32xbf16>
    %cst_18 = arith.constant dense<0.000000e+00> : vector<8x32xf32>
    %35 = tpu.matmul %33, %34, %cst_18 {dimension_numbers = #tpu.dot_dimension_numbers<[1], [0], [0], [1], [0, 0, 1, 1], [], []>} : vector<8x8xbf16>, vector<8x32xbf16>, vector<8x32xf32> -> vector<8x32xf32>
    %36 = arith.addf %16, %35 : vector<8x32xf32>
    %37 = vector.extract_strided_slice %8 {offsets = [0, 8], sizes = [8, 8], strides = [1, 1]} : vector<8x32xbf16> to vector<8x8xbf16>
    %38 = vector.extract_strided_slice %10 {offsets = [0, 8], sizes = [8, 8], strides = [1, 1]} : vector<8x32xbf16> to vector<8x8xbf16>
    %39 = vector.extract_strided_slice %12 {offsets = [0, 8], sizes = [8, 8], strides = [1, 1]} : vector<8x32xbf16> to vector<8x8xbf16>
    %cst_19 = arith.constant dense<0.000000e+00> : vector<8x8xf32>
    %40 = tpu.matmul %37, %38, %cst_19 {dimension_numbers = #tpu.dot_dimension_numbers<[1], [1], [0], [0], [0, 0, 1, 0], [], []>} : vector<8x8xbf16>, vector<8x8xbf16>, vector<8x8xf32> -> vector<8x8xf32>
    %cst_20 = arith.constant dense<0xFF800000> : vector<8xf32>
    %41 = vector.multi_reduction <maximumf>, %40, %cst_20 [1] : vector<8x8xf32> to vector<8xf32>
    %42 = vector.shape_cast %41 : vector<8xf32> to vector<8x1xf32>
    %43 = vector.broadcast %42 : vector<8x1xf32> to vector<8x8xf32>
    %44 = arith.subf %40, %43 : vector<8x8xf32>
    %45 = math.exp %44 : vector<8x8xf32>
    %cst_21 = arith.constant dense<0.000000e+00> : vector<8xf32>
    %46 = vector.multi_reduction <add>, %45, %cst_21 [1] : vector<8x8xf32> to vector<8xf32>
    %47 = vector.shape_cast %46 : vector<8xf32> to vector<8x1xf32>
    %48 = arith.truncf %45 : vector<8x8xf32> to vector<8x8xbf16>
    %cst_22 = arith.constant dense<0.000000e+00> : vector<8x8xf32>
    %49 = tpu.matmul %48, %39, %cst_22 {dimension_numbers = #tpu.dot_dimension_numbers<[1], [0], [0], [1], [0, 0, 1, 1], [], []>} : vector<8x8xbf16>, vector<8x8xbf16>, vector<8x8xf32> -> vector<8x8xf32>
    %50 = tpu.reciprocal %47 {approx = true} : vector<8x1xf32> -> vector<8x1xf32>
    %51 = vector.broadcast %50 : vector<8x1xf32> to vector<8x8xf32>
    %52 = arith.mulf %49, %51 : vector<8x8xf32>
    %53 = arith.truncf %52 : vector<8x8xf32> to vector<8x8xbf16>
    %54 = vector.extract_strided_slice %13 {offsets = [8, 0], sizes = [8, 32], strides = [1, 1]} : vector<32x32xbf16> to vector<8x32xbf16>
    %cst_23 = arith.constant dense<0.000000e+00> : vector<8x32xf32>
    %55 = tpu.matmul %53, %54, %cst_23 {dimension_numbers = #tpu.dot_dimension_numbers<[1], [0], [0], [1], [0, 0, 1, 1], [], []>} : vector<8x8xbf16>, vector<8x32xbf16>, vector<8x32xf32> -> vector<8x32xf32>
    %56 = arith.addf %36, %55 : vector<8x32xf32>
    %57 = vector.extract_strided_slice %8 {offsets = [0, 16], sizes = [8, 8], strides = [1, 1]} : vector<8x32xbf16> to vector<8x8xbf16>
    %58 = vector.extract_strided_slice %10 {offsets = [0, 16], sizes = [8, 8], strides = [1, 1]} : vector<8x32xbf16> to vector<8x8xbf16>
    %59 = vector.extract_strided_slice %12 {offsets = [0, 16], sizes = [8, 8], strides = [1, 1]} : vector<8x32xbf16> to vector<8x8xbf16>
    %cst_24 = arith.constant dense<0.000000e+00> : vector<8x8xf32>
    %60 = tpu.matmul %57, %58, %cst_24 {dimension_numbers = #tpu.dot_dimension_numbers<[1], [1], [0], [0], [0, 0, 1, 0], [], []>} : vector<8x8xbf16>, vector<8x8xbf16>, vector<8x8xf32> -> vector<8x8xf32>
    %cst_25 = arith.constant dense<0xFF800000> : vector<8xf32>
    %61 = vector.multi_reduction <maximumf>, %60, %cst_25 [1] : vector<8x8xf32> to vector<8xf32>
    %62 = vector.shape_cast %61 : vector<8xf32> to vector<8x1xf32>
    %63 = vector.broadcast %62 : vector<8x1xf32> to vector<8x8xf32>
    %64 = arith.subf %60, %63 : vector<8x8xf32>
    %65 = math.exp %64 : vector<8x8xf32>
    %cst_26 = arith.constant dense<0.000000e+00> : vector<8xf32>
    %66 = vector.multi_reduction <add>, %65, %cst_26 [1] : vector<8x8xf32> to vector<8xf32>
    %67 = vector.shape_cast %66 : vector<8xf32> to vector<8x1xf32>
    %68 = arith.truncf %65 : vector<8x8xf32> to vector<8x8xbf16>
    %cst_27 = arith.constant dense<0.000000e+00> : vector<8x8xf32>
    %69 = tpu.matmul %68, %59, %cst_27 {dimension_numbers = #tpu.dot_dimension_numbers<[1], [0], [0], [1], [0, 0, 1, 1], [], []>} : vector<8x8xbf16>, vector<8x8xbf16>, vector<8x8xf32> -> vector<8x8xf32>
    %70 = tpu.reciprocal %67 {approx = true} : vector<8x1xf32> -> vector<8x1xf32>
    %71 = vector.broadcast %70 : vector<8x1xf32> to vector<8x8xf32>
    %72 = arith.mulf %69, %71 : vector<8x8xf32>
    %73 = arith.truncf %72 : vector<8x8xf32> to vector<8x8xbf16>
    %74 = vector.extract_strided_slice %13 {offsets = [16, 0], sizes = [8, 32], strides = [1, 1]} : vector<32x32xbf16> to vector<8x32xbf16>
    %cst_28 = arith.constant dense<0.000000e+00> : vector<8x32xf32>
    %75 = tpu.matmul %73, %74, %cst_28 {dimension_numbers = #tpu.dot_dimension_numbers<[1], [0], [0], [1], [0, 0, 1, 1], [], []>} : vector<8x8xbf16>, vector<8x32xbf16>, vector<8x32xf32> -> vector<8x32xf32>
    %76 = arith.addf %56, %75 : vector<8x32xf32>
    %77 = vector.extract_strided_slice %8 {offsets = [0, 24], sizes = [8, 8], strides = [1, 1]} : vector<8x32xbf16> to vector<8x8xbf16>
    %78 = vector.extract_strided_slice %10 {offsets = [0, 24], sizes = [8, 8], strides = [1, 1]} : vector<8x32xbf16> to vector<8x8xbf16>
    %79 = vector.extract_strided_slice %12 {offsets = [0, 24], sizes = [8, 8], strides = [1, 1]} : vector<8x32xbf16> to vector<8x8xbf16>
    %cst_29 = arith.constant dense<0.000000e+00> : vector<8x8xf32>
    %80 = tpu.matmul %77, %78, %cst_29 {dimension_numbers = #tpu.dot_dimension_numbers<[1], [1], [0], [0], [0, 0, 1, 0], [], []>} : vector<8x8xbf16>, vector<8x8xbf16>, vector<8x8xf32> -> vector<8x8xf32>
    %cst_30 = arith.constant dense<0xFF800000> : vector<8xf32>
    %81 = vector.multi_reduction <maximumf>, %80, %cst_30 [1] : vector<8x8xf32> to vector<8xf32>
    %82 = vector.shape_cast %81 : vector<8xf32> to vector<8x1xf32>
    %83 = vector.broadcast %82 : vector<8x1xf32> to vector<8x8xf32>
    %84 = arith.subf %80, %83 : vector<8x8xf32>
    %85 = math.exp %84 : vector<8x8xf32>
    %cst_31 = arith.constant dense<0.000000e+00> : vector<8xf32>
    %86 = vector.multi_reduction <add>, %85, %cst_31 [1] : vector<8x8xf32> to vector<8xf32>
    %87 = vector.shape_cast %86 : vector<8xf32> to vector<8x1xf32>
    %88 = arith.truncf %85 : vector<8x8xf32> to vector<8x8xbf16>
    %cst_32 = arith.constant dense<0.000000e+00> : vector<8x8xf32>
    %89 = tpu.matmul %88, %79, %cst_32 {dimension_numbers = #tpu.dot_dimension_numbers<[1], [0], [0], [1], [0, 0, 1, 1], [], []>} : vector<8x8xbf16>, vector<8x8xbf16>, vector<8x8xf32> -> vector<8x8xf32>
    %90 = tpu.reciprocal %87 {approx = true} : vector<8x1xf32> -> vector<8x1xf32>
    %91 = vector.broadcast %90 : vector<8x1xf32> to vector<8x8xf32>
    %92 = arith.mulf %89, %91 : vector<8x8xf32>
    %93 = arith.truncf %92 : vector<8x8xf32> to vector<8x8xbf16>
    %94 = vector.extract_strided_slice %13 {offsets = [24, 0], sizes = [8, 32], strides = [1, 1]} : vector<32x32xbf16> to vector<8x32xbf16>
    %cst_33 = arith.constant dense<0.000000e+00> : vector<8x32xf32>
    %95 = tpu.matmul %93, %94, %cst_33 {dimension_numbers = #tpu.dot_dimension_numbers<[1], [0], [0], [1], [0, 0, 1, 1], [], []>} : vector<8x8xbf16>, vector<8x32xbf16>, vector<8x32xf32> -> vector<8x32xf32>
    %96 = arith.addf %76, %95 : vector<8x32xf32>
    %c0_34 = arith.constant 0 : index
    %c0_35 = arith.constant 0 : index
    %c0_36 = arith.constant 0 : index
    %97 = vector.load %arg8[%c0_34, %c0_35, %c0_36] : memref<1x8x32xf32, #tpu.memory_space<vmem>>, vector<1x8x32xf32>
    %98 = vector.shape_cast %97 : vector<1x8x32xf32> to vector<8x32xf32>
    %99 = vector.shape_cast %96 : vector<8x32xf32> to vector<1x8x32xf32>
    tpu.vector_store %arg8[%c0_34, %c0_35, %c0_36], %99 {strides = array<i32>} : memref<1x8x32xf32, #tpu.memory_space<vmem>>, vector<1x8x32xf32>,
    return
  }
  func.func @transform_0(%arg0: i32, %arg1: i32) -> (i32, i32, i32) {
    %c0_i32 = arith.constant 0 : i32
    %c0_i32_0 = arith.constant 0 : i32
    return %arg0, %arg1, %c0_i32 : i32, i32, i32
  }
  func.func @transform_1(%arg0: i32, %arg1: i32) -> (i32, i32, i32) {
    %c0_i32 = arith.constant 0 : i32
    %c0_i32_0 = arith.constant 0 : i32
    %c0_i32_1 = arith.constant 0 : i32
    return %arg0, %c0_i32, %c0_i32_0 : i32, i32, i32
  }
  func.func @transform_2(%arg0: i32, %arg1: i32) -> (i32, i32) {
    %c0_i32 = arith.constant 0 : i32
    %c0_i32_0 = arith.constant 0 : i32
    %c0_i32_1 = arith.constant 0 : i32
    return %c0_i32, %c0_i32_0 : i32, i32
  }
  func.func @transform_3(%arg0: i32, %arg1: i32) -> (i32, i32) {
    %c0_i32 = arith.constant 0 : i32
    %c0_i32_0 = arith.constant 0 : i32
    %c0_i32_1 = arith.constant 0 : i32
    return %c0_i32, %c0_i32_0 : i32, i32
  }
  func.func @transform_4(%arg0: i32, %arg1: i32) -> (i32, i32) {
    %c0_i32 = arith.constant 0 : i32
    %c0_i32_0 = arith.constant 0 : i32
    %c0_i32_1 = arith.constant 0 : i32
    return %c0_i32, %c0_i32_0 : i32, i32
  }
  func.func @transform_5(%arg0: i32, %arg1: i32) -> (i32, i32) {
    %c0_i32 = arith.constant 0 : i32
    %c0_i32_0 = arith.constant 0 : i32
    %c0_i32_1 = arith.constant 0 : i32
    return %c0_i32, %c0_i32_0 : i32, i32
  }
  func.func @transform_6(%arg0: i32, %arg1: i32) -> (i32, i32, i32) {
    %c0_i32 = arith.constant 0 : i32
    %c0_i32_0 = arith.constant 0 : i32
    return %arg0, %arg1, %c0_i32 : i32, i32, i32
  }
}

</mosaic_0001>

<bundles_post_ra>
// kernel: tpu_custom_call.1
= control target key start
LH: loop header
LB: loop body
LE: loop exit
PB: predicated region body
PF: predicated region fallthrough
CT: control target
= control target key end

     0   :  { %s2280_s0 = inlined_call_operand.hbm [shape: bf16[2,8,32], index: 0, kind: input, shape index: {}]   ;;  %s2281_s1 = inlined_call_operand.hbm [shape: bf16[2,8,32], index: 1, kind: input, shape index: {}]   ;;  %s2282_s2 = inlined_call_operand.hbm [shape: bf16[32,32], index: 2, kind: input, shape index: {}]   ;;  %s2283_s3 = inlined_call_operand.hbm [shape: bf16[32,64], index: 3, kind: input, shape index: {}]   ;;  %s2284_s4 = inlined_call_operand.hbm [shape: bf16[32,32], index: 4, kind: input, shape index: {}]   ;;  %s2285_s5 = inlined_call_operand.vmem [shape: f32[1,32], index: 5, kind: input, shape index: {}]   ;;  %s2286_s6 = inlined_call_operand.hbm [shape: f32[2,8,32], index: 6, kind: output, shape index: {}]  }
   0x1   :  { %2293 = sst [smem:[#allocation19_spill]] %s2282_s2 }
   0x2   :  { %2294 = sst [smem:[#allocation20_spill]] %s2283_s3 }
   0x3   :  { %2295 = sst [smem:[#allocation21_spill]] %s2284_s4 }
   0x4   :  { %11 = vsyncpa [#allocation3], 0 }
   0x5   :  { %13 = vsyncpa [#allocation3 + $0x1], 0 }
   0x6   :  { %14 = vsyncpa [#allocation6], 0 }
   0x7   :  { %16 = vsyncpa [#allocation6 + $0x1], 0 }
   0x8   :  { %17 = vsyncpa [#allocation9], 0 }
   0x9   :  { %18 = vsyncpa [#allocation4], 0 }
   0xa   :  { %20 = vsyncpa [#allocation4 + $0x1], 0  ;;  %s1871_s21 = smov 0   ;;  %s1873_s22 = smov 0  }
   0xb   :  { %s1875_s23 = smov 0   ;;  %s1877_s24 = smov 0  }
   0xc   :  { %s1879_s25 = smov 0   ;;  %s1881_s26 = smov 0  }
   0xd LB: > { %2296 = sst [smem:[#allocation17_spill]] %s1797_s21  ;;  %s1902_s27 = sadd.s32 4294967295, %s1817_s26   ;;  %s1817_s26 = sphi %s1881_s26, %s26_s26   ;;  %s1813_s25 = sphi %s1879_s25, %s2324_s25   ;;  %s1809_s24 = sphi %s1877_s24, %s2323_s24   ;;  %s1805_s23 = sphi %s1875_s23, %s2322_s23   ;;  %s1801_s22 = sphi %s1873_s22, %s2321_s22   ;;  %s1797_s21 = sphi %s1871_s21, %s2320_s21  }
   0xe   : > { %s1279_s28 = sadd.s32 4294967294, %s1817_s26   ;;  %p60_p0 = scmp.ne.s32.totalorder %s1801_s22, %s1797_s21 }
   0xf   : > { %p2287_p1 = scmp.eq.s32.totalorder %s1902_s27, 0  ;;  %p202_p3 = scmp.eq.s32.totalorder %s1279_s28, 1 }
  0x10   : > { %p1280_p5 = scmp.ge.s32.totalorder %s1817_s26, 1  ;;  %p209_p7 = scmp.lt.s32.totalorder %s1817_s26, 3 }
  0x11   : > { %p1911_p4 = por %p2287_p1, %p60_p0  ;;  %p1916_p6 = por %p202_p3, %p60_p0 }
  0x12   : > { %p1921_p8 = pnand %p1280_p5, %p209_p7  ;;  %s1819_s8 = smov [#allocation7]  }
  0x13   : > { %s2297_s29 = scalar_select %p1911_p4, 1, 0 }
  0x14   : > { %s2298_s30 = scalar_select %p1916_p6, 1, 0 }
  0x15   : > { %s2300_s7 = scalar_select %p1921_p8, 1, 0 }
  0x16   : > { %2299 = sst [smem:[#allocation18_spill]] %s2298_s30  ;;  %s221_s9 = sshll.u32 %s1819_s8, 4  ;;  %s1925_s9 = int_to_ptr.vmem [resolvable:$true] %s221_s9 }
  0x17   : > { %p1468_p9 = pneg %p1921_p8  ;;  %s1820_s11 = smov [#allocation8]  }
  0x18   : > { %s234_s12 = sshll.u32 %s1820_s11, 4  ;;  %s1821_s13 = smov [#allocation10]   ;;  %s1936_s12 = int_to_ptr.vmem [resolvable:$true] %s234_s12 }
  0x19   : > { %p1932_p11 = pnand %p1468_p9, %p2287_p1  ;;  %s1938_s14 = sshll.u32 %s1821_s13, 4  ;;  %s248_s14 = int_to_ptr.vmem [resolvable:$true] %s1938_s14 }
  0x1a   : > { %s2302_s2 = sld [smem:[#allocation19_spill]] }
  0x1b   : > { %p1948_p13 = pneg %p1932_p11 }
  0x20   : > { %s1579_s17 = scalar_lea.hbm %s2302_s2, 256 }
  0x21   : > { %p1580_p12 = scmp.ne.s32.totalorder %s2302_s2, %s1579_s17  ;;  %p1586_p5 = scmp.lt.u32.totalorder %s1579_s17, %s2302_s2 }
  0x23   : > { %p1582_p0 = pnand %p1948_p13, %p1580_p12 }
  0x25   : > { %p1583_p3 = pneg %p1582_p0 }
  0x27   : > { %p1588_p7 = pnand %p1586_p5, %p1583_p3 }
  0x29   : > { %1591 = shalt.err (!%p1588_p7)
}
  0x2a   : > { %s1592_s11 = scalar_lea.vmem %s1925_s9, 256  ;;  %p1600_p2 = scmp.lt.s32.totalorder %s1925_s9, %s1925_s9 }
  0x2b   : > { %p1593_p9 = scmp.ne.s32.totalorder %s1925_s9, %s1592_s11  ;;  %p1601_p6 = scmp.lt.s32.totalorder %s1592_s11, %s1592_s11 }
  0x2d   : > { %p1595_p10 = pnand %p1593_p9, %p1948_p13  ;;  %p1602_p12 = por %p1601_p6, %p1600_p2 }
  0x2f   : > { %p1596_p1 = pneg %p1595_p10 }
  0x31   : > { %p1603_p0 = pnand %p1602_p12, %p1596_p1 }
  0x33   : > { %1606 = shalt.err (!%p1603_p0)
}
  0x34   : > { %s1822_s13 = smov 64   ;;  %s1823_s15 = smov 4  }
  0x35   : > { %1471 = dma.hbm_to_vmem [thread:$0]  (!%p1932_p11), %s2302_s2, 256, %s1925_s9, [#allocation6], %s1822_s13, %s1822_s13, %s1823_s15  }
  0x36   : > { %s2304_s3 = sld [smem:[#allocation20_spill]] }
  0x3c   : > { %s1607_s28 = scalar_lea.hbm %s2304_s3, 256 }
  0x3d   : > { %p1608_p1 = scmp.ne.s32.totalorder %s2304_s3, %s1607_s28  ;;  %p1614_p10 = scmp.lt.u32.totalorder %s1607_s28, %s2304_s3 }
  0x3f   : > { %p1610_p2 = pnand %p1608_p1, %p1948_p13 }
  0x41   : > { %p1611_p6 = pneg %p1610_p2 }
  0x43   : > { %p1616_p3 = pnand %p1614_p10, %p1611_p6 }
  0x45   : > { %1619 = shalt.err (!%p1616_p3)
}
  0x46   : > { %s1620_s9 = scalar_lea.vmem %s1936_s12, 256  ;;  %p1628_p12 = scmp.lt.s32.totalorder %s1936_s12, %s1936_s12 }
  0x47   : > { %p1621_p5 = scmp.ne.s32.totalorder %s1936_s12, %s1620_s9  ;;  %p1629_p0 = scmp.lt.s32.totalorder %s1620_s9, %s1620_s9 }
  0x49   : > { %p1623_p7 = pnand %p1621_p5, %p1948_p13  ;;  %p1630_p1 = por %p1629_p0, %p1628_p12 }
  0x4b   : > { %p1624_p9 = pneg %p1623_p7 }
  0x4d   : > { %p1631_p2 = pnand %p1630_p1, %p1624_p9 }
  0x4f   : > { %1634 = shalt.err (!%p1631_p2)
}
  0x50   : > { %1474 = dma.hbm_to_vmem [thread:$0]  (!%p1932_p11), %s2304_s3, 256, %s1936_s12, [#allocation9], %s1822_s13, %s1822_s13, %s1823_s15  }
  0x51   : > { %s2305_s4 = sld [smem:[#allocation21_spill]] }
  0x57   : > { %s1635_s18 = scalar_lea.hbm %s2305_s4, 256 }
  0x58   : > { %p1636_p6 = scmp.ne.s32.totalorder %s2305_s4, %s1635_s18  ;;  %p1642_p5 = scmp.lt.u32.totalorder %s1635_s18, %s2305_s4 }
  0x5a   : > { %p1638_p10 = pnand %p1636_p6, %p1948_p13 }
  0x5c   : > { %p1639_p3 = pneg %p1638_p10 }
  0x5e   : > { %p1644_p7 = pnand %p1642_p5, %p1639_p3 }
  0x60   : > { %1647 = shalt.err (!%p1644_p7)
}
  0x61   : > { %s1648_s9 = scalar_lea.vmem %s248_s14, 256  ;;  %p1656_p1 = scmp.lt.s32.totalorder %s248_s14, %s248_s14 }
  0x62   : > { %p1649_p9 = scmp.ne.s32.totalorder %s248_s14, %s1648_s9  ;;  %p1657_p2 = scmp.lt.s32.totalorder %s1648_s9, %s1648_s9 }
  0x64   : > { %p1651_p12 = pnand %p1649_p9, %p1948_p13  ;;  %p1658_p4 = por %p1657_p2, %p1656_p1 }
  0x66   : > { %p1652_p0 = pneg %p1651_p12 }
  0x68   : > { %p1659_p8 = pnand %p1658_p4, %p1652_p0 }
  0x6a   : > { %1662 = shalt.err (!%p1659_p8)
}
  0x6b   : > { %1477 = dma.hbm_to_vmem [thread:$0]  (!%p1932_p11), %s2305_s4, 256, %s248_s14, [#allocation9], %s1822_s13, %s1822_s13, %s1823_s15  }
  0x6c   : > { %s47_s20 = sadd.s32 1, %s1805_s23  ;;  %s38_s10 = sadd.s32 1, %s1813_s25 }
  0x6d   : > { %p54_p4 = scmp.ne.s32.totalorder %s1805_s23, %s1801_s22  ;;  %p40_p8 = scmp.ge.s32.totalorder %s38_s10, 2 }
  0x6e   : > { %p55_p13 = scmp.eq.s32.totalorder %s1817_s26, 0  ;;  %p2306_p6 = scmp.eq.s32.totalorder %s1902_s27, 1 }
  0x6f   : > { %p1492_p3 = scmp.lt.s32.totalorder %s1817_s26, 2  ;;  %s2326_s10 = smov (%p40_p8, %s38_s10), 0 }
  0x70   : > { %p2027_p10 = por %p2306_p6, %p54_p4  ;;  %p56_p5 = por %p55_p13, %p54_p4 }
  0x71   : > { %s264_s16 = sand.u32 1, %s1805_s23   ;;  %s42_s17 = ssub.s32 %s1813_s25, %s2326_s10 }
  0x72   : > { %s2307_s30 = scalar_select %p2027_p10, 1, 0 }
  0x73   : > { %p45_p11 = scmp.eq.s32.totalorder %s42_s17, 0  ;;  %s2037_s14 = sshll.u32 %s264_s16, 2 }
  0x74   : > { %s1286_s13 = sshll.u32 %s1813_s25, 6  ;;  %s268_s8 = scalar_lea.vmem [#allocation2], %s2037_s14 }
  0x75   : > { %s2041_s15 = scalar_select %p45_p11, %s1805_s23, %s47_s20  }
  0x76   : > { %s2046_s28 = scalar_lea.hbm %s2280_s0, %s1286_s13  ;;  %s276_s11 = sshll.u32 %s268_s8, 4  ;;  %s2049_s11 = int_to_ptr.vmem [resolvable:$true] %s276_s11 }
  0x77   : > { %p2053_p7 = pnand %p1492_p3, %p56_p5  ;;  %s2060_s20 = scalar_lea.hbm %s2281_s1, %s1286_s13 }
  0x78   : > { %s283_s17 = sand.u32 1, %s1817_s26   ;;  %s265_s18 = scalar_lea.sflag [#allocation3], %s264_s16 }
  0x79   : > { %s1663_s19 = scalar_lea.hbm %s2046_s28, 64  ;;  %p1665_p12 = pneg %p2053_p7 }
  0x7a   : > { %p1664_p9 = scmp.ne.s32.totalorder %s2046_s28, %s1663_s19  ;;  %s1668_s3 = scalar_lea.hbm %s2280_s0, 128 }
  0x7b   : > { %p1669_p2 = scmp.lt.u32.totalorder %s2046_s28, %s2280_s0  ;;  %p1670_p4 = scmp.lt.u32.totalorder %s1668_s3, %s1663_s19 }
  0x7c   : > { %p1666_p0 = pnand %p1665_p12, %p1664_p9  ;;  %p1672_p13 = scmp.lt.u32.totalorder %s1663_s19, %s2046_s28 }
  0x7d   : > { %p1671_p8 = por %p1670_p4, %p1669_p2 }
  0x7e   : > { %p1667_p1 = pneg %p1666_p0 }
  0x7f   : > { %p1673_p6 = por %p1672_p13, %p1671_p8 }
  0x81   : > { %p1674_p3 = pnand %p1673_p6, %p1667_p1 }
  0x83   : > { %1677 = shalt.err (!%p1674_p3)
}
  0x84   : > { %s1678_s16 = scalar_lea.vmem %s2049_s11, 64  ;;  %s1824_s2 = smov [#allocation2]  }
  0x85   : > { %p1679_p5 = scmp.ne.s32.totalorder %s2049_s11, %s1678_s16  ;;  %s1683_s13 = sshll.u32 %s1824_s2, 4  ;;  %s1684_s13 = int_to_ptr.vmem [resolvable:$false] %s1683_s13 }
  0x86   : > { %s1685_s4 = scalar_lea.vmem %s1684_s13, 128  ;;  %p1686_p0 = scmp.lt.s32.totalorder %s2049_s11, %s1684_s13 }
  0x87   : > { %p1681_p11 = pnand %p1679_p5, %p1665_p12  ;;  %p1687_p2 = scmp.lt.s32.totalorder %s1685_s4, %s1678_s16 }
  0x89   : > { %p1682_p9 = pneg %p1681_p11  ;;  %p1688_p4 = por %p1687_p2, %p1686_p0 }
  0x8b   : > { %p1689_p8 = pnand %p1688_p4, %p1682_p9 }
  0x8d   : > { %1692 = shalt.err (!%p1689_p8)
}
  0x8e   : > { %1481 = dma.hbm_to_vmem [thread:$0]  (!%p2053_p7), %s2046_s28, 64, %s2049_s11, %s265_s18  }
  0x8f   : > { %s287_s3 = scalar_lea.vmem [#allocation5], %s2037_s14  ;;  %s284_s19 = scalar_lea.sflag [#allocation6], %s283_s17 }
  0x90   : > { %s294_s21 = sshll.u32 %s287_s3, 4  ;;  %s1693_s8 = scalar_lea.hbm %s2060_s20, 64  ;;  %s295_s21 = int_to_ptr.vmem [resolvable:$true] %s294_s21 }
  0x91   : > { %p1694_p1 = scmp.ne.s32.totalorder %s2060_s20, %s1693_s8  ;;  %s1698_s2 = scalar_lea.hbm %s2281_s1, 128 }
  0x92   : > { %p1699_p3 = scmp.lt.u32.totalorder %s2060_s20, %s2281_s1  ;;  %p1700_p5 = scmp.lt.u32.totalorder %s1698_s2, %s1693_s8 }
  0x93   : > { %p1696_p13 = pnand %p1694_p1, %p1665_p12  ;;  %p1702_p9 = scmp.lt.u32.totalorder %s1693_s8, %s2060_s20 }
  0x94   : > { %p1701_p11 = por %p1700_p5, %p1699_p3 }
  0x95   : > { %p1697_p6 = pneg %p1696_p13 }
  0x96   : > { %p1703_p0 = por %p1702_p9, %p1701_p11 }
  0x98   : > { %p1704_p2 = pnand %p1703_p0, %p1697_p6 }
  0x9a   : > { %1707 = shalt.err (!%p1704_p2)
}
  0x9b   : > { %s1708_s14 = scalar_lea.vmem %s295_s21, 64  ;;  %s1825_s28 = smov [#allocation5]  }
  0x9c   : > { %p1709_p4 = scmp.ne.s32.totalorder %s295_s21, %s1708_s14  ;;  %s1713_s11 = sshll.u32 %s1825_s28, 4  ;;  %s1714_s11 = int_to_ptr.vmem [resolvable:$false] %s1713_s11 }
  0x9d   : > { %s1715_s17 = scalar_lea.vmem %s1714_s11, 128  ;;  %p1716_p13 = scmp.lt.s32.totalorder %s295_s21, %s1714_s11 }
  0x9e   : > { %p1711_p8 = pnand %p1709_p4, %p1665_p12  ;;  %p1717_p10 = scmp.lt.s32.totalorder %s1715_s17, %s1708_s14 }
  0xa0   : > { %p1712_p1 = pneg %p1711_p8  ;;  %p1718_p3 = por %p1717_p10, %p1716_p13 }
  0xa2   : > { %p1719_p5 = pnand %p1718_p3, %p1712_p1 }
  0xa4   : > { %1722 = shalt.err (!%p1719_p5)
}
  0xa5   : > { %1484 = dma.hbm_to_vmem [thread:$0]  (!%p2053_p7), %s2060_s20, 64, %s295_s21, %s284_s19  }
  0xa6   : > { %p2309_p6 = scmp.ne.s32.totalorder %s2300_s7, 0 }
  0xa7   : > { %s2113_s18 = sand.u32 (!%p2309_p6), 1, %s1801_s22   ;;  %p2310_p12 = scmp.ne.s32.totalorder (!%p2309_p6), %s2297_s29, 0 }
  0xa8   : > { %303 = sbr.rel (%p2309_p6) target bundleno = 2010 (0x7da), region = 44  ;;  %s1290_s3 = sshll.u32 (!%p2309_p6), %s2113_s18, 2 }
  0xa9   : > { %s306_s8 = scalar_lea.sflag (!%p2309_p6), [#allocation3], %s2113_s18  ;;  %s309_s12 = scalar_lea.vmem (!%p2309_p6), [#allocation2], %s1290_s3 }
  0xaf   : > { %1776 = dma.done.wait (%p2310_p12), %s306_s8, 64  }
  0xb0   : > { %1778 = vsyncadd (%p2310_p12), %s306_s8, 4294967232  ;;  %s314_s9 = sand.u32 1, %s1902_s27   ;;  %s318_s7 = scalar_lea.vmem [#allocation5], %s1290_s3 }
  0xb1   : > { %s315_s20 = scalar_lea.sflag [#allocation6], %s314_s9 }
  0xb2   : > { %1780 = dma.done.wait (%p2310_p12), %s315_s20, 64  }
  0xb3   : > { %1782 = vsyncadd (%p2310_p12), %s315_s20, 4294967232  ;;  %p2311_p10 = scmp.eq.s32.totalorder %s1902_s27, 0 }
  0xb5   : > { %1784 = dma.done.wait (%p2311_p10), [#allocation6], 256   ;;  %p2312_p7 = pmov %p2311_p10 }
  0xb7   : > { %1786 = vsyncadd (%p2312_p7), [#allocation6], 4294967040  ;;  %p2313_p11 = pmov %p2312_p7 }
  0xb8   : > { %p2314_p9 = pmov %p2312_p7 }
  0xb9   : > { %1788 = dma.done.wait (%p2313_p11), [#allocation9], 512  }
  0xba   : > { %1790 = vsyncadd (%p2314_p9), [#allocation9], 4294966784  ;;  %v1826_v0 = vmov 0.0   ;;  %vm1827_vm0 = vmmov 0   ;;  %v1559_v1 = vld [vmem:[#allocation7] sm:$0xff]   ;;  %v1560_v2 = vld [vmem:[#allocation7 + $0x8] sm:$0xff]  }
  0xbb   : > { %1349 = vmatprep.subr.bf16.mxu1 %v1826_v0  ;;  %1353 = vmatprep.mubr.msk.bf16.mxu1 %vm1827_vm0, %v1826_v0  ;;  %v365_v3 = vld [vmem:[%s309_s12] sm:$0xf]  ;;  %vm383_vm1 = vcmask 261120   ;;  %v1562_v5 = vld [vmem:[#allocation8 + $0x8] sm:$0xff]   ;;  %vm499_vm2 = vcmask 64512   ;;  %s1828_s27 = smov 120  }
  0xbc   : > { %1365 = vmatprep.subr.bf16.mxu0 %v1826_v0  ;;  %1367 = vmatprep.mubr.msk.bf16.mxu0 %vm1827_vm0, %v1826_v0  ;;  %v1561_v4 = vld [vmem:[#allocation8] sm:$0xff]   ;;  %v366_v6 = vld [vmem:[%s318_s7] sm:$0xf]  ;;  %s1829_s29 = smov 112   ;;  %s1830_s21 = smov 96   ;;  %vm562_vm3 = vcmask 1043456  }
  0xbd   : > { %1350 = vmatpush3.bf16.msra.mxu1 %v1559_v1  ;;  %s1831_s19 = smov 80   ;;  %s1832_s16 = smov 104   ;;  %v488_v39 = vld [vmem:[#allocation10] sm:$0xf] }
  0xbe   : > { %1351 = vmatprep.subr.bf16.mxu1 %v1826_v0  ;;  %v613_v40 = vsel %vm562_vm3, %v488_v39, 0  ;;  %s1833_s2 = smov 88   ;;  %s1834_s13 = smov 72  }
  0xbf   : > { %s1295_s4 = sshll.u32 %s2113_s18, 3  ;;  %s1316_s11 = sshll.u32 %s1809_s24, 7 }
  0xc0   : > { %s363_s17 = scalar_lea.vmem [#allocation11], %s1295_s4  ;;  %s2230_s9 = scalar_lea.hbm %s2286_s6, %s1316_s11 }
  0xc1   : > { %1352 = vmatpush3.bf16.msra.mxu1 %v1560_v2  ;;  %s1147_s3 = sshll.u32 %s363_s17, 4  ;;  %s1133_s24 = scalar_lea.sflag [#allocation4], %s2113_s18  ;;  %s2232_s3 = int_to_ptr.vmem [resolvable:$true] %s1147_s3 }
  0xc2   : > { %1357 = vmatprep.subr.bf16.mxu1 %v1826_v0  ;;  %s1723_s20 = scalar_lea.vmem %s2232_s3, 128  ;;  %p2315_p2 = scmp.ne.s32.totalorder %s2307_s30, 0 }
  0xc3   : > { %p1724_p0 = scmp.ne.s32.totalorder %s2232_s3, %s1723_s20  ;;  %s1835_s7 = smov [#allocation11]  }
  0xc4   : > { %1354 = vmatmul.mubr.msk.bf16.vlgmr.msra.gmra.mrb[0].mxu1 %vm383_vm1, %v365_v3 }
  0xc5   : > { %1358 = vmatpush3.bf16.msra.mxu1 %v1561_v4  ;;  %1361 = vmatprep.mubr.msk.bf16.mxu1 %vm1827_vm0, %v1826_v0  ;;  %p1725_p4 = pnand %p1724_p0, %p2315_p2 }
  0xc6   : > { %1359 = vmatprep.subr.bf16.mxu1 %v1826_v0 }
  0xc7   : > { %p1726_p8 = pneg %p1725_p4 }
  0xc9   : > { %1360 = vmatpush3.bf16.msra.mxu1 %v1562_v5 }
  0xca   : > { %1371 = vmatprep.subr.bf16.mxu1 %v1826_v0 }
  0xcc   : > { %1362 = vmatmul.mubr.msk.bf16.vlgmr.msra.gmra.mrb[4].mxu1 %vm383_vm1, %v366_v6 }
  0xcd   : > { %1373 = vmatprep.mubr.msk.bf16.mxu1 %vm1827_vm0, %v1826_v0 }
 0x197   : > { %v421_v7 = vpop.f32.mrb[0].mxu1 }
 0x198   : > { %v1355_v8 = vpop.f32.mrb[1].mxu1  ;;  %v486_v17 = vpack.c.bf16 %v421_v7, %v421_v7 }
 0x199   : > { %v424_v9 = vpop.f32.mrb[2].mxu1 }
 0x19a   : > { %v1356_v10 = vpop.f32.mrb[3].mxu1 }
 0x19f   : > { %v480_v11 = vpop.f32.mrb[4].mxu1 }
 0x1a0   : > { %v2150_v12 = vpack.c.bf16 %v480_v11, %v480_v11  ;;  %v1363_v13 = vpop.f32.mrb[5].mxu1 }
 0x1a1   : > { %v483_v14 = vpop.f32.mrb[6].mxu1 }
 0x1a2   : > { %659 = vrot.lane.b32.xlu1 %v2150_v12, %s1828_s27  ;;  %v1364_v15 = vpop.f32.mrb[7].mxu1  ;;  %v504_v16 = vsel %vm499_vm2, %v2150_v12, 0  ;;  %v489_v14 = vld [vmem:[#allocation10 + $0x4] sm:$0xf] }
 0x1a3   : > { %1366 = vmatpush3.bf16.xpose.msra.mxu0 %v504_v16  ;;  %v772_v15 = vsel %vm562_vm3, %v489_v14, 0 }
 0x1a4   : > { %1377 = vmatprep.subr.bf16.mxu0 %v1826_v0 }
 0x1a6   : > { %657 = vrot.lane.b32.xlu1 %v486_v17, %s1828_s27  ;;  %s1727_s27 = sshll.u32 %s1835_s7, 4  ;;  %s1728_s27 = int_to_ptr.vmem [resolvable:$false] %s1727_s27 }
 0x1a7   : > { %p1730_p1 = scmp.lt.s32.totalorder %s2232_s3, %s1728_s27 }
 0x1aa   : > { %817 = vrot.lane.b32.xlu1 %v2150_v12, %s1829_s29  ;;  %1368 = vmatmul.mubr.msk.bf16.vlgmr.msra.gmra.mrb[0].mxu0 %vm499_vm2, %v486_v17 }
 0x1ab   : > { %1379 = vmatprep.mubr.msk.bf16.mxu0 %vm1827_vm0, %v1826_v0  ;;  %1378 = vmatpush3.bf16.msra.mxu0 %v613_v40 }
 0x1ac   : > { %1389 = vmatprep.subr.bf16.mxu0 %v1826_v0 }
 0x1ae   : > { %815 = vrot.lane.b32.xlu1 %v486_v17, %s1829_s29  ;;  %s1729_s29 = scalar_lea.vmem %s1728_s27, 256 }
 0x1af   : > { %p1731_p13 = scmp.lt.s32.totalorder %s1729_s29, %s1723_s20 }
 0x1b1   : > { %p1732_p3 = por %p1731_p13, %p1730_p1 }
 0x1b3   : > { %p1733_p5 = pnand %p1732_p3, %p1726_p8 }
 0x214   : > { %v660_v28 = vpop.permute.xlu1 %659 }
 0x215   : > { %v665_v33 = vsel %vm499_vm2, %v660_v28, 0 }
 0x218   : > { %v658_v32 = vpop.permute.xlu1 %657 }
 0x21c   : > { %v818_v34 = vpop.permute.xlu1 %817 }
 0x21d   : > { %v823_v35 = vsel %vm499_vm2, %v818_v34, 0 }
 0x220   : > { %v816_v37 = vpop.permute.xlu1 %815 }
 0x27d   : > { %v540_v18 = vpop.f32.mrb[0].mxu0 }
 0x27e   : > { %v1369_v19 = vpop.f32.mrb[1].mxu0  ;;  %v546_v20 = vsel %vm499_vm2, %v540_v18, -inf }
 0x27f   : > { %547 = vmax.xlane.f32.xlu0 %v546_v20  ;;  %v543_v21 = vpop.f32.mrb[2].mxu0 }
 0x280   : > { %v1370_v22 = vpop.f32.mrb[3].mxu0 }
 0x295   : > { %557 = vrot.lane.b32.xlu0 %v2150_v12, %s1830_s21 }
 0x299   : > { %875 = vrot.lane.b32.xlu0 %v2150_v12, %s1831_s19 }
 0x29d   : > { %975 = vrot.lane.b32.xlu0 %v2150_v12, %s1832_s16 }
 0x2a1   : > { %973 = vrot.lane.b32.xlu0 %v486_v17, %s1832_s16 }
 0x30c   : > { %v548_v23 = vpop.xlane.xlu0 %547 }
 0x30d   : > { %v549_v24 = vsub.f32 %v540_v18, %v548_v23 }
 0x30f   : > { %v550_v25 = vmul.f32 1.442695, %v549_v24  ;;  %v490_v24 = vld [vmem:[#allocation10 + $0x8] sm:$0xf] }
 0x310   : > { %v558_v26 = vpop.permute.xlu0 %557 }
 0x311   : > { %1563 = vpow2.f32 %v550_v25  ;;  %v564_v27 = vsel %vm562_vm3, %v558_v26, 0 }
 0x312   : > { %1372 = vmatpush3.bf16.msra.mxu1 %v564_v27 }
 0x313   : > { %1383 = vmatprep.subr.bf16.mxu1 %v1826_v0 }
 0x314   : > { %v876_v36 = vpop.permute.xlu0 %875 }
 0x315   : > { %v881_v38 = vsel %vm562_vm3, %v876_v36, 0 }
 0x318   : > { %v976_v41 = vpop.permute.xlu0 %975 }
 0x319   : > { %v981_v8 = vsel %vm499_vm2, %v976_v41, 0 }
 0x31b   : > { %v1564_v29 = vpop.eup %1563 }
 0x31c   : > { %v552_v30 = vsel %vm499_vm2, %v1564_v29, 0.0  ;;  %v555_v31 = vpack.c.bf16 %v1564_v29, %v1564_v29  ;;  %v974_v42 = vpop.permute.xlu0 %973  ;;  %v930_v29 = vsel %vm562_vm3, %v490_v24, 0 }
 0x31d   : > { %553 = vadd.xlane.f32.xlu0 %v552_v30 }
 0x31e   : > { %1374 = vmatmul.mubr.msk.bf16.vlgmr.msra.gmra.mrb[8].mxu1 %vm499_vm2, %v555_v31 }
 0x31f   : > { %1384 = vmatpush3.bf16.xpose.msra.mxu1 %v665_v33  ;;  %1385 = vmatprep.mubr.msk.bf16.mxu1 %vm1827_vm0, %v1826_v0 }
 0x320   : > { %1401 = vmatprep.subr.bf16.mxu1 %v1826_v0 }
 0x326   : > { %1386 = vmatmul.mubr.msk.bf16.vlgmr.msra.gmra.mrb[12].mxu1 %vm499_vm2, %v658_v32 }
 0x327   : > { %1402 = vmatpush3.bf16.xpose.msra.mxu1 %v823_v35  ;;  %1403 = vmatprep.mubr.msk.bf16.mxu1 %vm1827_vm0, %v1826_v0 }
 0x328   : > { %1407 = vmatprep.subr.bf16.mxu1 %v1826_v0 }
 0x32e   : > { %1404 = vmatmul.mubr.msk.bf16.vlgmr.msra.gmra.mrb[16].mxu1 %vm499_vm2, %v816_v37 }
 0x32f   : > { %1408 = vmatpush3.bf16.msra.mxu1 %v881_v38  ;;  %1409 = vmatprep.mubr.msk.bf16.mxu1 %vm1827_vm0, %v1826_v0 }
 0x330   : > { %1419 = vmatprep.subr.bf16.mxu1 %v1826_v0 }
 0x3aa   : > { %v554_v43 = vpop.xlane.xlu0 %553 }
 0x3ab   : > { %1565 = vrcp.f32 %v554_v43 }
 0x3b5   : > { %v1566_v44 = vpop.eup %1565 }
 0x3f1   : > { %v600_v45 = vpop.f32.mrb[8].mxu1 }
 0x3f2   : > { %v607_v46 = vmul.f32 %v1566_v44, %v600_v45  ;;  %v1375_v47 = vpop.f32.mrb[9].mxu1 }
 0x3f3   : > { %v603_v48 = vpop.f32.mrb[10].mxu1 }
 0x3f4   : > { %v608_v49 = vpack.c.bf16 %v607_v46, %v607_v46  ;;  %v1376_v50 = vpop.f32.mrb[11].mxu1  ;;  %v491_v46 = vld [vmem:[#allocation10 + $0xc] sm:$0xf] }
 0x3f5   : > { %v1088_v47 = vsel %vm562_vm3, %v491_v46, 0 }
 0x3f6   : > { %1380 = vmatmul.mubr.msk.bf16.vlgmr.msra.gmra.mrb[4].mxu0 %vm499_vm2, %v608_v49 }
 0x3f7   : > { %1391 = vmatprep.mubr.msk.bf16.mxu0 %vm1827_vm0, %v1826_v0 }
 0x3f9   : > { %v701_v51 = vpop.f32.mrb[12].mxu1 }
 0x3fa   : > { %v1387_v52 = vpop.f32.mrb[13].mxu1  ;;  %v707_v60 = vsel %vm499_vm2, %v701_v51, -inf }
 0x3fb   : > { %v704_v53 = vpop.f32.mrb[14].mxu1 }
 0x3fc   : > { %v1388_v54 = vpop.f32.mrb[15].mxu1 }
 0x401   : > { %v859_v55 = vpop.f32.mrb[16].mxu1 }
 0x402   : > { %v1405_v56 = vpop.f32.mrb[17].mxu1  ;;  %v865_v57 = vsel %vm499_vm2, %v859_v55, -inf }
 0x403   : > { %866 = vmax.xlane.f32.xlu1 %v865_v57  ;;  %v862_v58 = vpop.f32.mrb[18].mxu1 }
 0x404   : > { %v1406_v59 = vpop.f32.mrb[19].mxu1 }
 0x407   : > { %708 = vmax.xlane.f32.xlu1 %v707_v60 }
 0x418   : > { %717 = vrot.lane.b32.xlu1 %v2150_v12, %s1833_s2 }
 0x490   : > { %v867_v61 = vpop.xlane.xlu1 %866 }
 0x491   : > { %v868_v62 = vsub.f32 %v859_v55, %v867_v61 }
 0x493   : > { %v869_v63 = vmul.f32 1.442695, %v868_v62 }
 0x494   : > { %v709_v1 = vpop.xlane.xlu1 %708 }
 0x495   : > { %1567 = vpow2.f32 %v869_v63  ;;  %v710_v2 = vsub.f32 %v701_v51, %v709_v1 }
 0x497   : > { %v711_v3 = vmul.f32 1.442695, %v710_v2 }
 0x498   : > { %v718_v4 = vpop.permute.xlu1 %717 }
 0x499   : > { %1569 = vpow2.f32 %v711_v3  ;;  %v723_v5 = vsel %vm562_vm3, %v718_v4, 0 }
 0x49a   : > { %1390 = vmatpush3.bf16.msra.mxu0 %v723_v5 }
 0x49b   : > { %1395 = vmatprep.subr.bf16.mxu0 %v1826_v0 }
 0x49f   : > { %v1568_v6 = vpop.eup %1567 }
 0x4a0   : > { %v874_v7 = vpack.c.bf16 %v1568_v6, %v1568_v6  ;;  %v871_v13 = vsel %vm499_vm2, %v1568_v6, 0.0 }
 0x4a2   : > { %1410 = vmatmul.mubr.msk.bf16.vlgmr.msra.gmra.mrb[20].mxu1 %vm499_vm2, %v874_v7 }
 0x4a3   : > { %v1570_v9 = vpop.eup %1569  ;;  %1420 = vmatpush3.bf16.xpose.msra.mxu1 %v981_v8  ;;  %1421 = vmatprep.mubr.msk.bf16.mxu1 %vm1827_vm0, %v1826_v0 }
 0x4a4   : > { %v713_v10 = vsel %vm499_vm2, %v1570_v9, 0.0  ;;  %v716_v11 = vpack.c.bf16 %v1570_v9, %v1570_v9 }
 0x4a5   : > { %714 = vadd.xlane.f32.xlu0 %v713_v10 }
 0x4a6   : > { %1392 = vmatmul.mubr.msk.bf16.vlgmr.msra.gmra.mrb[8].mxu0 %vm499_vm2, %v716_v11 }
 0x4a7   : > { %1397 = vmatprep.mubr.msk.bf16.mxu0 %vm1827_vm0, %v1826_v0  ;;  %1396 = vmatpush3.bf16.msra.mxu0 %v772_v15 }
 0x4a8   : > { %1413 = vmatprep.subr.bf16.mxu0 %v1826_v0 }
 0x4a9   : > { %872 = vadd.xlane.f32.xlu0 %v871_v13 }
 0x4aa   : > { %1422 = vmatmul.mubr.msk.bf16.vlgmr.msra.gmra.mrb[24].mxu1 %vm499_vm2, %v974_v42 }
 0x4bf   : > { %1033 = vrot.lane.b32.xlu0 %v2150_v12, %s1834_s13 }
 0x532   : > { %v715_v16 = vpop.xlane.xlu0 %714 }
 0x533   : > { %1571 = vrcp.f32 %v715_v16 }
 0x536   : > { %v873_v18 = vpop.xlane.xlu0 %872 }
 0x537   : > { %1573 = vrcp.f32 %v873_v18 }
 0x53a   : > { %v1034_v37 = vpop.permute.xlu0 %1033 }
 0x53b   : > { %v1039_v39 = vsel %vm562_vm3, %v1034_v37, 0 }
 0x53d   : > { %v1572_v22 = vpop.eup %1571 }
 0x541   : > { %v1574_v35 = vpop.eup %1573 }
 0x575   : > { %v917_v17 = vpop.f32.mrb[20].mxu1 }
 0x576   : > { %v1411_v19 = vpop.f32.mrb[21].mxu1  ;;  %v924_v36 = vmul.f32 %v1574_v35, %v917_v17 }
 0x577   : > { %v920_v20 = vpop.f32.mrb[22].mxu1 }
 0x578   : > { %v1412_v21 = vpop.f32.mrb[23].mxu1  ;;  %v925_v38 = vpack.c.bf16 %v924_v36, %v924_v36 }
 0x579   : > { %v759_v23 = vpop.f32.mrb[8].mxu0 }
 0x57a   : > { %v766_v25 = vmul.f32 %v1572_v22, %v759_v23  ;;  %v1393_v26 = vpop.f32.mrb[9].mxu0 }
 0x57b   : > { %v762_v12 = vpop.f32.mrb[10].mxu0 }
 0x57c   : > { %v767_v27 = vpack.c.bf16 %v766_v25, %v766_v25  ;;  %v1394_v28 = vpop.f32.mrb[11].mxu0 }
 0x57d   : > { %v1017_v30 = vpop.f32.mrb[24].mxu1 }
 0x57e   : > { %1398 = vmatmul.mubr.msk.bf16.vlgmr.msra.gmra.mrb[4].mxu0 %vm499_vm2, %v767_v27  ;;  %v1423_v31 = vpop.f32.mrb[25].mxu1  ;;  %v1023_v32 = vsel %vm499_vm2, %v1017_v30, -inf }
 0x57f   : > { %1024 = vmax.xlane.f32.xlu1 %v1023_v32  ;;  %v1020_v33 = vpop.f32.mrb[26].mxu1  ;;  %1414 = vmatpush3.bf16.msra.mxu0 %v930_v29 }
 0x580   : > { %v1424_v34 = vpop.f32.mrb[27].mxu1  ;;  %1415 = vmatprep.mubr.msk.bf16.mxu0 %vm1827_vm0, %v1826_v0  ;;  %1425 = vmatprep.subr.bf16.mxu0 %v1826_v0 }
 0x58a   : > { %1416 = vmatmul.mubr.msk.bf16.vlgmr.msra.gmra.mrb[4].mxu0 %vm499_vm2, %v925_v38 }
 0x58b   : > { %1426 = vmatpush3.bf16.msra.mxu0 %v1039_v39  ;;  %1427 = vmatprep.mubr.msk.bf16.mxu0 %vm1827_vm0, %v1826_v0 }
 0x58c   : > { %1431 = vmatprep.subr.bf16.mxu0 %v1826_v0 }
 0x60c   : > { %v1025_v40 = vpop.xlane.xlu1 %1024 }
 0x60d   : > { %v1026_v41 = vsub.f32 %v1017_v30, %v1025_v40 }
 0x60f   : > { %v1027_v42 = vmul.f32 1.442695, %v1026_v41 }
 0x611   : > { %1575 = vpow2.f32 %v1027_v42 }
 0x61b   : > { %v1576_v43 = vpop.eup %1575 }
 0x61c   : > { %v1029_v44 = vsel %vm499_vm2, %v1576_v43, 0.0  ;;  %v1032_v45 = vpack.c.bf16 %v1576_v43, %v1576_v43 }
 0x61d   : > { %1030 = vadd.xlane.f32.xlu0 %v1029_v44 }
 0x61e   : > { %1428 = vmatmul.mubr.msk.bf16.vlgmr.msra.gmra.mrb[12].mxu0 %vm499_vm2, %v1032_v45 }
 0x61f   : > { %1433 = vmatprep.mubr.msk.bf16.mxu0 %vm1827_vm0, %v1826_v0  ;;  %1432 = vmatpush3.bf16.msra.mxu0 %v1088_v47  ;;  %v1302_v0 = vld [vmem:[%s2285_s5] ss:$0 sm:$0xff] }
 0x6aa   : > { %v1031_v48 = vpop.xlane.xlu0 %1030 }
 0x6ab   : > { %1577 = vrcp.f32 %v1031_v48 }
 0x6b5   : > { %v1578_v49 = vpop.eup %1577 }
 0x6f1   : > { %v1075_v50 = vpop.f32.mrb[12].mxu0 }
 0x6f2   : > { %v1082_v51 = vmul.f32 %v1578_v49, %v1075_v50  ;;  %v1429_v52 = vpop.f32.mrb[13].mxu0 }
 0x6f3   : > { %v1078_v53 = vpop.f32.mrb[14].mxu0 }
 0x6f4   : > { %v1083_v54 = vpack.c.bf16 %v1082_v51, %v1082_v51  ;;  %v1430_v55 = vpop.f32.mrb[15].mxu0 }
 0x6f6   : > { %1434 = vmatmul.mubr.msk.bf16.vlgmr.msra.gmra.mrb[4].mxu0 %vm499_vm2, %v1083_v54 }
 0x7c9   : > { %v1124_v56 = vpop.f32.mrb[4].mxu0 }
 0x7ca   : > { %v1437_v57 = vadd.f32 %v1302_v0, %v1124_v56  ;;  %v1435_v58 = vpop.f32.mrb[5].mxu0 }
 0x7cb   : > { %v1127_v59 = vpop.f32.mrb[6].mxu0 }
 0x7cc   : > { %v1436_v60 = vpop.f32.mrb[7].mxu0  ;;  %1131 = vst.msk [vmem:[%s363_s17] sm:$0xff] %vm383_vm1, %v1437_v57 }
 0x7cd   : > { %1736 = shalt.err (!%p1733_p5)
}
 0x7ce   : > { %s1737_s18 = scalar_lea.hbm %s2230_s9, 128  ;;  %s1741_s16 = scalar_lea.hbm %s2286_s6, 256 }
 0x7cf   : > { %p1738_p6 = scmp.ne.s32.totalorder %s2230_s9, %s1737_s18  ;;  %p1742_p7 = scmp.lt.u32.totalorder %s2230_s9, %s2286_s6 }
 0x7d0   : > { %p1743_p11 = scmp.lt.u32.totalorder %s1741_s16, %s1737_s18  ;;  %p1745_p0 = scmp.lt.u32.totalorder %s1737_s18, %s2230_s9 }
 0x7d1   : > { %p1739_p12 = pnand %p1738_p6, %p2315_p2 }
 0x7d2   : > { %p1744_p9 = por %p1743_p11, %p1742_p7 }
 0x7d3   : > { %p1740_p10 = pneg %p1739_p12 }
 0x7d4   : > { %p1746_p4 = por %p1745_p0, %p1744_p9 }
 0x7d6   : > { %p1747_p8 = pnand %p1746_p4, %p1740_p10 }
 0x7d8   : > { %1750 = shalt.err (!%p1747_p8)
}
 0x7d9   : > { %1466 = dma.vmem_to_hbm [thread:$0]  (%p2315_p2), %s2232_s3, 128, %s2230_s9, %s1133_s24  }
 0x7da PF: > { %s2316_s4 = sld [smem:[#allocation17_spill]]  ;;  %s2317_s14 = sld [smem:[#allocation18_spill]] }
 0x7db   : > { %p2319_p13 = scmp.ge.s32.totalorder %s1817_s26, 2 }
 0x7e0   : > { %s1159_s28 = sand.u32 1, %s2316_s4   ;;  %p2318_p1 = scmp.ne.s32.totalorder %s2317_s14, 0 }
 0x7e1   : > { %s1160_s11 = scalar_lea.sflag [#allocation4], %s1159_s28 }
 0x7e2   : > { %p1486_p3 = pnand %p2319_p13, %p2318_p1 }
 0x7e4   : > { %1792 = dma.done.wait (!%p1486_p3), %s1160_s11, 128  }
 0x7e5   : > { %1794 = vsyncadd (!%p1486_p3), %s1160_s11, 4294967168  ;;  %s26_s26 = sadd.s32 1, %s1817_s26   ;;  %s2320_s21 = smov %s1801_s22 }
 0x7e6   : > { %p23_p5 = scmp.ge.s32.totalorder %s26_s26, 4   ;;  %s2321_s22 = smov %s1805_s23 }
 0x7e7   : > { %s2322_s23 = smov %s2041_s15  ;;  %s2323_s24 = smov %s1813_s25 }
 0x7e8   : > { %s2324_s25 = smov %s2326_s10  ;;  %25 = sbr.rel (!%p23_p5) target bundleno = 13 (0xd), region = 114 }
 0x7ef   :  { %1165 = vsyncpa [#allocation3], 1 }
 0x7f0   :  { %1167 = vsyncpa [#allocation3 + $0x1], 1 }
 0x7f1   :  { %1168 = vsyncpa [#allocation6], 1 }
 0x7f2   :  { %1170 = vsyncpa [#allocation6 + $0x1], 1 }
 0x7f3   :  { %1171 = vsyncpa [#allocation9], 1 }
 0x7f4   :  { %1172 = vsyncpa [#allocation4], 1 }
 0x7f5   :  { %1174 = vsyncpa [#allocation4 + $0x1], 1 }

</bundles_post_ra>
